<compile_context>
chip_gen: v5e
topology: v5e:2x2
jax: 0.10.0
libtpu: 0.0.40
codegen_flags: <defaults>
</compile_context>

<pallas_src>
import functools

import jax
import jax.numpy as jnp
from jax import lax
from jax.experimental import pallas as pl
from jax.experimental.pallas import tpu as pltpu


def _round_up(x, m):
    return (x + m - 1) // m * m


def elman_kernel(xp_ref, wh_ref, h_ref, *, unroll):
    """One time-block of the Elman recurrence.

    xp_ref: (Tblk, Bp, Hp) f32   pre-projected inputs x_t @ W_x.T + b_i2h (zero-padded)
    wh_ref: (Hp, Hp)       bf16  recurrent weight, transposed (used as h @ wh)
    h_ref : (Bp, Hp)       f32   hidden state; output block index is constant across
                                 the time grid axis -> resident accumulator in VMEM.
    """
    @pl.when(pl.program_id(0) == 0)
    def _():
        h_ref[...] = jnp.zeros_like(h_ref)

    wh = wh_ref[...]                   # bf16, loaded once per block, reused every step
    t_blk = xp_ref.shape[0]

    def step(t, h):
        # h = tanh( xp[t] + h @ W_h.T );  bf16 MXU operands, f32 accumulate + tanh.
        pre = xp_ref[t] + jnp.dot(h.astype(jnp.bfloat16), wh,
                                  preferred_element_type=jnp.float32)
        return jnp.tanh(pre)

    h_ref[...] = lax.fori_loop(0, t_blk, step, h_ref[...], unroll=unroll)


def elman_rnn_forward(x, w_i2h, b_i2h, w_h2o, b_h2o, *,
                      input_size, hidden_size, output_size,
                      max_time_block=256):
    """x: (B, T, input_size) f32 -> (B, output_size) f32."""
    B, T, _ = x.shape
    H = hidden_size

    # Split i2h weight: cat((x_t, h)) @ W_i2h.T == x_t @ W_x.T + h @ W_h.T
    w_x = w_i2h[:, :input_size]                      # (H, in)
    w_h = w_i2h[:, input_size:]                      # (H, H)

    # Input projection hoisted off the serial path (one batched matmul, bias folded in),
    # time-major so the kernel loop indexes the leading axis.
    xp = jnp.einsum("bti,hi->tbh", x, w_x) + b_i2h   # (T, B, H) f32

    # Pad to MXU/vreg-friendly shapes: lanes -> mult of 128, sublanes -> mult of 8.
    # Bias was folded BEFORE padding, so padded hidden lanes stay exactly 0 (tanh(0)=0).
    Hp = _round_up(H, 128)
    Bp = _round_up(B, 8)
    xp = jnp.pad(xp, ((0, 0), (0, Bp - B), (0, Hp - H)))
    wh_t = jnp.pad(w_h.T, ((0, Hp - H), (0, Hp - H))).astype(jnp.bfloat16)  # (Hp, Hp)

    # Time-blocked grid; whole sequence in one block when T is small.
    if T <= max_time_block:
        t_block = T
    else:
        t_block = max(d for d in range(1, max_time_block + 1) if T % d == 0)
    n_blocks = T // t_block
    unroll = min(t_block, 8)

    h_padded = pl.pallas_call(
        functools.partial(elman_kernel, unroll=unroll),
        out_shape=jax.ShapeDtypeStruct((Bp, Hp), jnp.float32),
        grid_spec=pltpu.PrefetchScalarGridSpec(
            num_scalar_prefetch=0,
            grid=(n_blocks,),
            in_specs=[
                pl.BlockSpec((t_block, Bp, Hp), lambda tb: (tb, 0, 0)),
                pl.BlockSpec((Hp, Hp), lambda tb: (0, 0)),
            ],
            out_specs=pl.BlockSpec((Bp, Hp), lambda tb: (0, 0)),
        ),
        compiler_params=pltpu.CompilerParams(
            dimension_semantics=("arbitrary",)),
    )(xp, wh_t)

    # Lane-dense kernel output; the tiny N=1 readout lives in the wrapper.
    h = h_padded[:B, :H]
    return h @ w_h2o.T + b_h2o


def reference_forward(x, w_i2h, b_i2h, w_h2o, b_h2o, hidden_size):
    B, T, _ = x.shape
    h = jnp.zeros((B, hidden_size), jnp.float32)
    for t in range(T):
        inp = jnp.concatenate([x[:, t, :], h], axis=1)
        h = jnp.tanh(inp @ w_i2h.T + b_i2h)
    return h @ w_h2o.T + b_h2o


if __name__ == "__main__":
    # Small shapes consistent with the module: input_size=2, output_size=1.
    B, T = 8, 8
    input_size, hidden_size, output_size = 2, 32, 1

    key = jax.random.PRNGKey(0)
    k_x, k_w1, k_b1, k_w2, k_b2 = jax.random.split(key, 5)

    x = jax.random.normal(k_x, (B, T, input_size), jnp.float32)

    # Deterministic param init (nn.Linear-style uniform bounds).
    bound1 = 1.0 / jnp.sqrt(input_size + hidden_size)
    w_i2h = jax.random.uniform(k_w1, (hidden_size, input_size + hidden_size),
                               jnp.float32, -bound1, bound1)
    b_i2h = jax.random.uniform(k_b1, (hidden_size,), jnp.float32, -bound1, bound1)

    bound2 = 1.0 / jnp.sqrt(hidden_size)
    w_h2o = jax.random.uniform(k_w2, (output_size, hidden_size),
                               jnp.float32, -bound2, bound2)
    b_h2o = jax.random.uniform(k_b2, (output_size,), jnp.float32, -bound2, bound2)

    out = elman_rnn_forward(
        x, w_i2h, b_i2h, w_h2o, b_h2o,
        input_size=input_size, hidden_size=hidden_size, output_size=output_size,
    )
    out = jax.block_until_ready(out)

    ref = reference_forward(x, w_i2h, b_i2h, w_h2o, b_h2o, hidden_size)
    assert out.shape == (B, output_size)
    # Tolerance loosened vs. the pure-f32 version: the recurrent matmul now uses bf16
    # MXU operands, whose rounding compounds (damped by tanh) over the T-step chain.
    assert jnp.allclose(out, ref, rtol=5e-2, atol=5e-2), (out, ref)

    print("KERNEL_OK")
</pallas_src>

<mosaic_0001>
module attributes {stable_mosaic.version = 11 : i64} {
  func.func @elman_kernel(%arg0: i32, %arg1: memref<8x8x128xf32, #tpu.memory_space<vmem>>, %arg2: memref<128x128xbf16, #tpu.memory_space<vmem>>, %arg3: memref<8x128xf32, #tpu.memory_space<vmem>>) attributes {dimension_semantics = [#tpu.dimension_semantics<arbitrary>], iteration_bounds = array<i64: 1>, scalar_prefetch = 0 : i64, scratch_operands = 0 : i64, tpu.core_type = #tpu.core_type<tc>, window_params = [{transform_indices = @transform_0, window_bounds = array<i64: 8, 8, 128>}, {pipeline_mode = #tpu.pipeline_mode<synchronous>, transform_indices = @transform_1, window_bounds = array<i64: 128, 128>}, {pipeline_mode = #tpu.pipeline_mode<synchronous>, transform_indices = @transform_2, window_bounds = array<i64: 8, 128>}]} {
    %c0_i32 = arith.constant 0 : i32
    %0 = arith.cmpi eq, %arg0, %c0_i32 : i32
    %1 = arith.extui %0 : i1 to i32
    %c0_i32_0 = arith.constant 0 : i32
    %2 = arith.cmpi ne, %1, %c0_i32_0 : i32
    scf.if %2 {
      %cst_30 = arith.constant 0.000000e+00 : f32
      %62 = vector.broadcast %cst_30 : f32 to vector<8x128xf32>
      %c0_31 = arith.constant 0 : index
      %c0_32 = arith.constant 0 : index
      %63 = vector.load %arg3[%c0_31, %c0_32] : memref<8x128xf32, #tpu.memory_space<vmem>>, vector<8x128xf32>
      tpu.vector_store %arg3[%c0_31, %c0_32], %62 {strides = array<i32>} : memref<8x128xf32, #tpu.memory_space<vmem>>, vector<8x128xf32>,
    } else {
    }
    %c0 = arith.constant 0 : index
    %c0_1 = arith.constant 0 : index
    %3 = vector.load %arg2[%c0, %c0_1] : memref<128x128xbf16, #tpu.memory_space<vmem>>, vector<128x128xbf16>
    %c0_2 = arith.constant 0 : index
    %c0_3 = arith.constant 0 : index
    %4 = vector.load %arg3[%c0_2, %c0_3] : memref<8x128xf32, #tpu.memory_space<vmem>>, vector<8x128xf32>
    %c0_i32_4 = arith.constant 0 : i32
    %5 = arith.index_cast %c0_i32_4 : i32 to index
    %c0_5 = arith.constant 0 : index
    %c0_6 = arith.constant 0 : index
    %6 = vector.load %arg1[%5, %c0_5, %c0_6] : memref<8x8x128xf32, #tpu.memory_space<vmem>>, vector<1x8x128xf32>
    %7 = vector.shape_cast %6 : vector<1x8x128xf32> to vector<8x128xf32>
    %8 = arith.truncf %4 : vector<8x128xf32> to vector<8x128xbf16>
    %cst = arith.constant dense<0.000000e+00> : vector<8x128xf32>
    %9 = tpu.matmul %8, %3, %cst {dimension_numbers = #tpu.dot_dimension_numbers<[1], [0], [0], [1], [0, 0, 1, 1], [], []>} : vector<8x128xbf16>, vector<128x128xbf16>, vector<8x128xf32> -> vector<8x128xf32>
    %10 = arith.addf %7, %9 : vector<8x128xf32>
    %11 = math.tanh %10 : vector<8x128xf32>
    %c1_i32 = arith.constant 1 : i32
    %12 = arith.index_cast %c1_i32 : i32 to index
    %c0_7 = arith.constant 0 : index
    %c0_8 = arith.constant 0 : index
    %13 = vector.load %arg1[%12, %c0_7, %c0_8] : memref<8x8x128xf32, #tpu.memory_space<vmem>>, vector<1x8x128xf32>
    %14 = vector.shape_cast %13 : vector<1x8x128xf32> to vector<8x128xf32>
    %15 = arith.truncf %11 : vector<8x128xf32> to vector<8x128xbf16>
    %cst_9 = arith.constant dense<0.000000e+00> : vector<8x128xf32>
    %16 = tpu.matmul %15, %3, %cst_9 {dimension_numbers = #tpu.dot_dimension_numbers<[1], [0], [0], [1], [0, 0, 1, 1], [], []>} : vector<8x128xbf16>, vector<128x128xbf16>, vector<8x128xf32> -> vector<8x128xf32>
    %17 = arith.addf %14, %16 : vector<8x128xf32>
    %18 = math.tanh %17 : vector<8x128xf32>
    %c2_i32 = arith.constant 2 : i32
    %19 = arith.index_cast %c2_i32 : i32 to index
    %c0_10 = arith.constant 0 : index
    %c0_11 = arith.constant 0 : index
    %20 = vector.load %arg1[%19, %c0_10, %c0_11] : memref<8x8x128xf32, #tpu.memory_space<vmem>>, vector<1x8x128xf32>
    %21 = vector.shape_cast %20 : vector<1x8x128xf32> to vector<8x128xf32>
    %22 = arith.truncf %18 : vector<8x128xf32> to vector<8x128xbf16>
    %cst_12 = arith.constant dense<0.000000e+00> : vector<8x128xf32>
    %23 = tpu.matmul %22, %3, %cst_12 {dimension_numbers = #tpu.dot_dimension_numbers<[1], [0], [0], [1], [0, 0, 1, 1], [], []>} : vector<8x128xbf16>, vector<128x128xbf16>, vector<8x128xf32> -> vector<8x128xf32>
    %24 = arith.addf %21, %23 : vector<8x128xf32>
    %25 = math.tanh %24 : vector<8x128xf32>
    %c3_i32 = arith.constant 3 : i32
    %26 = arith.index_cast %c3_i32 : i32 to index
    %c0_13 = arith.constant 0 : index
    %c0_14 = arith.constant 0 : index
    %27 = vector.load %arg1[%26, %c0_13, %c0_14] : memref<8x8x128xf32, #tpu.memory_space<vmem>>, vector<1x8x128xf32>
    %28 = vector.shape_cast %27 : vector<1x8x128xf32> to vector<8x128xf32>
    %29 = arith.truncf %25 : vector<8x128xf32> to vector<8x128xbf16>
    %cst_15 = arith.constant dense<0.000000e+00> : vector<8x128xf32>
    %30 = tpu.matmul %29, %3, %cst_15 {dimension_numbers = #tpu.dot_dimension_numbers<[1], [0], [0], [1], [0, 0, 1, 1], [], []>} : vector<8x128xbf16>, vector<128x128xbf16>, vector<8x128xf32> -> vector<8x128xf32>
    %31 = arith.addf %28, %30 : vector<8x128xf32>
    %32 = math.tanh %31 : vector<8x128xf32>
    %c4_i32 = arith.constant 4 : i32
    %33 = arith.index_cast %c4_i32 : i32 to index
    %c0_16 = arith.constant 0 : index
    %c0_17 = arith.constant 0 : index
    %34 = vector.load %arg1[%33, %c0_16, %c0_17] : memref<8x8x128xf32, #tpu.memory_space<vmem>>, vector<1x8x128xf32>
    %35 = vector.shape_cast %34 : vector<1x8x128xf32> to vector<8x128xf32>
    %36 = arith.truncf %32 : vector<8x128xf32> to vector<8x128xbf16>
    %cst_18 = arith.constant dense<0.000000e+00> : vector<8x128xf32>
    %37 = tpu.matmul %36, %3, %cst_18 {dimension_numbers = #tpu.dot_dimension_numbers<[1], [0], [0], [1], [0, 0, 1, 1], [], []>} : vector<8x128xbf16>, vector<128x128xbf16>, vector<8x128xf32> -> vector<8x128xf32>
    %38 = arith.addf %35, %37 : vector<8x128xf32>
    %39 = math.tanh %38 : vector<8x128xf32>
    %c5_i32 = arith.constant 5 : i32
    %40 = arith.index_cast %c5_i32 : i32 to index
    %c0_19 = arith.constant 0 : index
    %c0_20 = arith.constant 0 : index
    %41 = vector.load %arg1[%40, %c0_19, %c0_20] : memref<8x8x128xf32, #tpu.memory_space<vmem>>, vector<1x8x128xf32>
    %42 = vector.shape_cast %41 : vector<1x8x128xf32> to vector<8x128xf32>
    %43 = arith.truncf %39 : vector<8x128xf32> to vector<8x128xbf16>
    %cst_21 = arith.constant dense<0.000000e+00> : vector<8x128xf32>
    %44 = tpu.matmul %43, %3, %cst_21 {dimension_numbers = #tpu.dot_dimension_numbers<[1], [0], [0], [1], [0, 0, 1, 1], [], []>} : vector<8x128xbf16>, vector<128x128xbf16>, vector<8x128xf32> -> vector<8x128xf32>
    %45 = arith.addf %42, %44 : vector<8x128xf32>
    %46 = math.tanh %45 : vector<8x128xf32>
    %c6_i32 = arith.constant 6 : i32
    %47 = arith.index_cast %c6_i32 : i32 to index
    %c0_22 = arith.constant 0 : index
    %c0_23 = arith.constant 0 : index
    %48 = vector.load %arg1[%47, %c0_22, %c0_23] : memref<8x8x128xf32, #tpu.memory_space<vmem>>, vector<1x8x128xf32>
    %49 = vector.shape_cast %48 : vector<1x8x128xf32> to vector<8x128xf32>
    %50 = arith.truncf %46 : vector<8x128xf32> to vector<8x128xbf16>
    %cst_24 = arith.constant dense<0.000000e+00> : vector<8x128xf32>
    %51 = tpu.matmul %50, %3, %cst_24 {dimension_numbers = #tpu.dot_dimension_numbers<[1], [0], [0], [1], [0, 0, 1, 1], [], []>} : vector<8x128xbf16>, vector<128x128xbf16>, vector<8x128xf32> -> vector<8x128xf32>
    %52 = arith.addf %49, %51 : vector<8x128xf32>
    %53 = math.tanh %52 : vector<8x128xf32>
    %c7_i32 = arith.constant 7 : i32
    %54 = arith.index_cast %c7_i32 : i32 to index
    %c0_25 = arith.constant 0 : index
    %c0_26 = arith.constant 0 : index
    %55 = vector.load %arg1[%54, %c0_25, %c0_26] : memref<8x8x128xf32, #tpu.memory_space<vmem>>, vector<1x8x128xf32>
    %56 = vector.shape_cast %55 : vector<1x8x128xf32> to vector<8x128xf32>
    %57 = arith.truncf %53 : vector<8x128xf32> to vector<8x128xbf16>
    %cst_27 = arith.constant dense<0.000000e+00> : vector<8x128xf32>
    %58 = tpu.matmul %57, %3, %cst_27 {dimension_numbers = #tpu.dot_dimension_numbers<[1], [0], [0], [1], [0, 0, 1, 1], [], []>} : vector<8x128xbf16>, vector<128x128xbf16>, vector<8x128xf32> -> vector<8x128xf32>
    %59 = arith.addf %56, %58 : vector<8x128xf32>
    %60 = math.tanh %59 : vector<8x128xf32>
    %c8_i32 = arith.constant 8 : i32
    %c0_28 = arith.constant 0 : index
    %c0_29 = arith.constant 0 : index
    %61 = vector.load %arg3[%c0_28, %c0_29] : memref<8x128xf32, #tpu.memory_space<vmem>>, vector<8x128xf32>
    tpu.vector_store %arg3[%c0_28, %c0_29], %60 {strides = array<i32>} : memref<8x128xf32, #tpu.memory_space<vmem>>, vector<8x128xf32>,
    return
  }
  func.func @transform_0(%arg0: i32) -> (i32, i32, i32) {
    %c0_i32 = arith.constant 0 : i32
    %c0_i32_0 = arith.constant 0 : i32
    %c0_i32_1 = arith.constant 0 : i32
    return %arg0, %c0_i32, %c0_i32_0 : i32, i32, i32
  }
  func.func @transform_1(%arg0: i32) -> (i32, i32) {
    %c0_i32 = arith.constant 0 : i32
    %c0_i32_0 = arith.constant 0 : i32
    %c0_i32_1 = arith.constant 0 : i32
    return %c0_i32, %c0_i32_0 : i32, i32
  }
  func.func @transform_2(%arg0: i32) -> (i32, i32) {
    %c0_i32 = arith.constant 0 : i32
    %c0_i32_0 = arith.constant 0 : i32
    %c0_i32_1 = arith.constant 0 : i32
    return %c0_i32, %c0_i32_0 : i32, i32
  }
}

</mosaic_0001>

<bundles_post_ra>
// kernel: tpu_custom_call.1
= control target key start
LH: loop header
LB: loop body
LE: loop exit
PB: predicated region body
PF: predicated region fallthrough
CT: control target
= control target key end

     0   :  { %7 = vsyncpa [#allocation3], 0  ;;  %s450_s0 = inlined_call_operand.hbm [shape: f32[8,8,128], index: 0, kind: input, shape index: {}]   ;;  %s451_s1 = inlined_call_operand.hbm [shape: bf16[128,128], index: 1, kind: input, shape index: {}]   ;;  %s452_s2 = inlined_call_operand.hbm [shape: f32[8,128], index: 2, kind: output, shape index: {}]  }
   0x1   :  { %8 = vsyncpa [#allocation6], 0 }
   0x2   :  { %9 = vsyncpa [#allocation4], 0  ;;  %s14_s11 = sshll.u32 %s450_s0, 4  ;;  %s418_s12 = smov [#allocation2]   ;;  %s15_s11 = int_to_ptr.hbm [resolvable:$true] %s14_s11 }
   0x3   :  { %s16_s13 = sshll.u32 %s418_s12, 4  ;;  %s27_s16 = sshll.u32 %s451_s1, 4  ;;  %s17_s13 = int_to_ptr.vmem [resolvable:$true] %s16_s13  ;;  %s28_s16 = int_to_ptr.hbm [resolvable:$true] %s27_s16 }
   0x4   :  { %s419_s17 = smov 128   ;;  %s420_s18 = smov 8  }
   0x5   :  { %22 = dma.hbm_to_vmem [thread:$0]  %s15_s11, 1024, %s17_s13, [#allocation3], %s419_s17, %s419_s17, %s420_s18  }
   0x6   :  { %s421_s19 = smov [#allocation5]   ;;  %s422_s21 = smov 64  }
   0x7   :  { %s29_s20 = sshll.u32 %s421_s19, 4  ;;  %s423_s22 = smov 4   ;;  %s30_s20 = int_to_ptr.vmem [resolvable:$true] %s29_s20 }
   0x8   :  { %35 = dma.hbm_to_vmem [thread:$0]  %s28_s16, 1024, %s30_s20, [#allocation6], %s422_s21, %s422_s21, %s423_s22  }
   0x9   :  { %412 = dma.done.wait [#allocation3], 1024  }
   0xa   :  { %413 = vsyncadd [#allocation3], 4294966272 }
   0xb   :  { %414 = dma.done.wait [#allocation6], 1024  }
   0xc   :  { %415 = vsyncadd [#allocation6], 4294966272  ;;  %v315_v0 = vld [vmem:[#allocation5 + $0x38] sm:$0xff]  ;;  %v314_v1 = vld [vmem:[#allocation5 + $0x30] sm:$0xff]  ;;  %v424_v8 = vmov 0.0|0.0   ;;  %s425_s0 = smov [#allocation7]  }
   0xd   :  { %116 = vmatpush.bf16.msra.mxu0 %v315_v0  ;;  %134 = vmatpush.bf16.msra.mxu1 %v315_v0  ;;  %v313_v2 = vld [vmem:[#allocation5 + $0x28] sm:$0xff]  ;;  %v312_v3 = vld [vmem:[#allocation5 + $0x20] sm:$0xff]  ;;  %v311_v4 = vld [vmem:[#allocation5 + $0x18] sm:$0xff]  ;;  %s263_s1 = sshll.u32 %s425_s0, 4  ;;  %s265_s25 = sshll.u32 %s452_s2, 4  ;;  %s264_s1 = int_to_ptr.vmem [resolvable:$true] %s263_s1  ;;  %s266_s25 = int_to_ptr.hbm [resolvable:$true] %s265_s25 }
   0xe   :  { %152 = vmatpush.bf16.msra.mxu2 %v315_v0  ;;  %170 = vmatpush.bf16.msra.mxu3 %v315_v0  ;;  %v310_v5 = vld [vmem:[#allocation5 + $0x10] sm:$0xff]  ;;  %v309_v6 = vld [vmem:[#allocation5 + $0x8] sm:$0xff]  ;;  %v308_v7 = vld [vmem:[#allocation5] sm:$0xff] }
   0xf   :  { %v66_v9 = vld [vmem:[#allocation2] sm:$0xff]  ;;  %v132_v15 = vld [vmem:[#allocation2 + $0x8] sm:$0xff]  ;;  %v150_v21 = vld [vmem:[#allocation2 + $0x10] sm:$0xff] }
  0x10   :  { %v168_v27 = vld [vmem:[#allocation2 + $0x18] sm:$0xff]  ;;  %v186_v33 = vld [vmem:[#allocation2 + $0x20] sm:$0xff]  ;;  %v204_v39 = vld [vmem:[#allocation2 + $0x28] sm:$0xff] }
  0x11   :  { %117 = vmatpush.bf16.msra.mxu0 %v314_v1  ;;  %135 = vmatpush.bf16.msra.mxu1 %v314_v1  ;;  %v222_v45 = vld [vmem:[#allocation2 + $0x30] sm:$0xff]  ;;  %v240_v51 = vld [vmem:[#allocation2 + $0x38] sm:$0xff] }
  0x12   :  { %153 = vmatpush.bf16.msra.mxu2 %v314_v1  ;;  %171 = vmatpush.bf16.msra.mxu3 %v314_v1 }
  0x15   :  { %118 = vmatpush.bf16.msra.mxu0 %v313_v2  ;;  %136 = vmatpush.bf16.msra.mxu1 %v313_v2 }
  0x16   :  { %154 = vmatpush.bf16.msra.mxu2 %v313_v2  ;;  %172 = vmatpush.bf16.msra.mxu3 %v313_v2 }
  0x19   :  { %119 = vmatpush.bf16.msra.mxu0 %v312_v3  ;;  %137 = vmatpush.bf16.msra.mxu1 %v312_v3 }
  0x1a   :  { %155 = vmatpush.bf16.msra.mxu2 %v312_v3  ;;  %173 = vmatpush.bf16.msra.mxu3 %v312_v3 }
  0x1d   :  { %120 = vmatpush.bf16.msra.mxu0 %v311_v4  ;;  %138 = vmatpush.bf16.msra.mxu1 %v311_v4 }
  0x1e   :  { %156 = vmatpush.bf16.msra.mxu2 %v311_v4  ;;  %174 = vmatpush.bf16.msra.mxu3 %v311_v4 }
  0x21   :  { %121 = vmatpush.bf16.msra.mxu0 %v310_v5  ;;  %139 = vmatpush.bf16.msra.mxu1 %v310_v5 }
  0x22   :  { %157 = vmatpush.bf16.msra.mxu2 %v310_v5  ;;  %175 = vmatpush.bf16.msra.mxu3 %v310_v5 }
  0x25   :  { %122 = vmatpush.bf16.msra.mxu0 %v309_v6  ;;  %140 = vmatpush.bf16.msra.mxu1 %v309_v6 }
  0x26   :  { %158 = vmatpush.bf16.msra.mxu2 %v309_v6  ;;  %176 = vmatpush.bf16.msra.mxu3 %v309_v6 }
  0x29   :  { %123 = vmatpush.bf16.msra.mxu0 %v308_v7  ;;  %141 = vmatpush.bf16.msra.mxu1 %v308_v7 }
  0x2a   :  { %159 = vmatpush.bf16.msra.mxu2 %v308_v7  ;;  %177 = vmatpush.bf16.msra.mxu3 %v308_v7 }
  0x2c   :  { %124 = vmatmul.bf16.vlgmr.msra.gmra.mxu0 %v424_v8 }
  0x2d   :  { %188 = vmatpush.bf16.msrb.mxu0 %v315_v0  ;;  %206 = vmatpush.bf16.msrb.mxu1 %v315_v0 }
  0x2e   :  { %224 = vmatpush.bf16.msrb.mxu2 %v315_v0  ;;  %242 = vmatpush.bf16.msrb.mxu3 %v315_v0 }
  0x31   :  { %189 = vmatpush.bf16.msrb.mxu0 %v314_v1  ;;  %207 = vmatpush.bf16.msrb.mxu1 %v314_v1 }
  0x32   :  { %225 = vmatpush.bf16.msrb.mxu2 %v314_v1  ;;  %243 = vmatpush.bf16.msrb.mxu3 %v314_v1 }
  0x35   :  { %190 = vmatpush.bf16.msrb.mxu0 %v313_v2  ;;  %208 = vmatpush.bf16.msrb.mxu1 %v313_v2 }
  0x36   :  { %226 = vmatpush.bf16.msrb.mxu2 %v313_v2  ;;  %244 = vmatpush.bf16.msrb.mxu3 %v313_v2 }
  0x39   :  { %191 = vmatpush.bf16.msrb.mxu0 %v312_v3  ;;  %209 = vmatpush.bf16.msrb.mxu1 %v312_v3 }
  0x3a   :  { %227 = vmatpush.bf16.msrb.mxu2 %v312_v3  ;;  %245 = vmatpush.bf16.msrb.mxu3 %v312_v3 }
  0x3d   :  { %192 = vmatpush.bf16.msrb.mxu0 %v311_v4  ;;  %210 = vmatpush.bf16.msrb.mxu1 %v311_v4 }
  0x3e   :  { %228 = vmatpush.bf16.msrb.mxu2 %v311_v4  ;;  %246 = vmatpush.bf16.msrb.mxu3 %v311_v4 }
  0x41   :  { %193 = vmatpush.bf16.msrb.mxu0 %v310_v5  ;;  %211 = vmatpush.bf16.msrb.mxu1 %v310_v5 }
  0x42   :  { %229 = vmatpush.bf16.msrb.mxu2 %v310_v5  ;;  %247 = vmatpush.bf16.msrb.mxu3 %v310_v5 }
  0x45   :  { %194 = vmatpush.bf16.msrb.mxu0 %v309_v6  ;;  %212 = vmatpush.bf16.msrb.mxu1 %v309_v6 }
  0x46   :  { %230 = vmatpush.bf16.msrb.mxu2 %v309_v6  ;;  %248 = vmatpush.bf16.msrb.mxu3 %v309_v6 }
  0x49   :  { %195 = vmatpush.bf16.msrb.mxu0 %v308_v7  ;;  %213 = vmatpush.bf16.msrb.mxu1 %v308_v7 }
  0x4a   :  { %231 = vmatpush.bf16.msrb.mxu2 %v308_v7  ;;  %249 = vmatpush.bf16.msrb.mxu3 %v308_v7 }
  0xa9   :  { %v125_v10 = vpop.f32.mrf.mxu0 }
  0xaa   :  { %v129_v11 = vadd.f32 %v125_v10, %v66_v9 }
  0xac   :  { %324 = vtanh.f32 %v129_v11 }
  0xb1   :  { %v127_v12 = vpop.f32.mrf.mxu0 }
  0xb2   :  { %v325_v13 = vpop.eup %324 }
  0xb3   :  { %v133_v14 = vpack.c.bf16 %v325_v13, %v325_v13 }
  0xb5   :  { %142 = vmatmul.bf16.vlgmr.msra.gmra.mxu1 %v133_v14 }
 0x132   :  { %v143_v16 = vpop.f32.mrf.mxu1 }
 0x133   :  { %v147_v17 = vadd.f32 %v143_v16, %v132_v15 }
 0x135   :  { %326 = vtanh.f32 %v147_v17 }
 0x13a   :  { %v145_v18 = vpop.f32.mrf.mxu1 }
 0x13b   :  { %v327_v19 = vpop.eup %326 }
 0x13c   :  { %v151_v20 = vpack.c.bf16 %v327_v19, %v327_v19 }
 0x13e   :  { %160 = vmatmul.bf16.vlgmr.msra.gmra.mxu2 %v151_v20 }
 0x1c1   :  { %v161_v22 = vpop.f32.mrf.mxu2 }
 0x1c2   :  { %v165_v23 = vadd.f32 %v161_v22, %v150_v21 }
 0x1c4   :  { %328 = vtanh.f32 %v165_v23 }
 0x1c9   :  { %v163_v24 = vpop.f32.mrf.mxu2 }
 0x1ca   :  { %v329_v25 = vpop.eup %328 }
 0x1cb   :  { %v169_v26 = vpack.c.bf16 %v329_v25, %v329_v25 }
 0x1cd   :  { %178 = vmatmul.bf16.vlgmr.msra.gmra.mxu3 %v169_v26 }
 0x250   :  { %v179_v28 = vpop.f32.mrf.mxu3 }
 0x251   :  { %v183_v29 = vadd.f32 %v179_v28, %v168_v27 }
 0x253   :  { %330 = vtanh.f32 %v183_v29 }
 0x258   :  { %v181_v30 = vpop.f32.mrf.mxu3 }
 0x259   :  { %v331_v31 = vpop.eup %330 }
 0x25a   :  { %v187_v32 = vpack.c.bf16 %v331_v31, %v331_v31 }
 0x25c   :  { %196 = vmatmul.bf16.vlgmr.msrb.gmra.mxu0 %v187_v32 }
 0x2d9   :  { %v197_v34 = vpop.f32.mrf.mxu0 }
 0x2da   :  { %v201_v35 = vadd.f32 %v197_v34, %v186_v33 }
 0x2dc   :  { %332 = vtanh.f32 %v201_v35 }
 0x2e1   :  { %v199_v36 = vpop.f32.mrf.mxu0 }
 0x2e2   :  { %v333_v37 = vpop.eup %332 }
 0x2e3   :  { %v205_v38 = vpack.c.bf16 %v333_v37, %v333_v37 }
 0x2e5   :  { %214 = vmatmul.bf16.vlgmr.msrb.gmra.mxu1 %v205_v38 }
 0x362   :  { %v215_v40 = vpop.f32.mrf.mxu1 }
 0x363   :  { %v219_v41 = vadd.f32 %v215_v40, %v204_v39 }
 0x365   :  { %334 = vtanh.f32 %v219_v41 }
 0x36a   :  { %v217_v42 = vpop.f32.mrf.mxu1 }
 0x36b   :  { %v335_v43 = vpop.eup %334 }
 0x36c   :  { %v223_v44 = vpack.c.bf16 %v335_v43, %v335_v43 }
 0x36e   :  { %232 = vmatmul.bf16.vlgmr.msrb.gmra.mxu2 %v223_v44 }
 0x3f1   :  { %v233_v46 = vpop.f32.mrf.mxu2 }
 0x3f2   :  { %v237_v47 = vadd.f32 %v233_v46, %v222_v45 }
 0x3f4   :  { %336 = vtanh.f32 %v237_v47 }
 0x3f9   :  { %v235_v48 = vpop.f32.mrf.mxu2 }
 0x3fa   :  { %v337_v49 = vpop.eup %336 }
 0x3fb   :  { %v241_v50 = vpack.c.bf16 %v337_v49, %v337_v49 }
 0x3fd   :  { %250 = vmatmul.bf16.vlgmr.msrb.gmra.mxu3 %v241_v50 }
 0x480   :  { %v251_v52 = vpop.f32.mrf.mxu3 }
 0x481   :  { %v255_v53 = vadd.f32 %v251_v52, %v240_v51 }
 0x483   :  { %338 = vtanh.f32 %v255_v53 }
 0x488   :  { %v253_v54 = vpop.f32.mrf.mxu3 }
 0x489   :  { %v339_v55 = vpop.eup %338 }
 0x48a   :  { %257 = vst [vmem:[#allocation7] sm:$0xff] %v339_v55 }
 0x48b   :  { %268 = dma.vmem_to_hbm [thread:$0]  %s264_s1, 128, %s266_s25, [#allocation4]  }
 0x48c   :  { %416 = dma.done.wait [#allocation4], 128  }
 0x48d   :  { %417 = vsyncadd [#allocation4], 4294967168 }
 0x48e   :  { %273 = vsyncpa [#allocation3], 1 }
 0x48f   :  { %274 = vsyncpa [#allocation6], 1 }
 0x490   :  { %275 = vsyncpa [#allocation4], 1 }

</bundles_post_ra>
